<compile_context>
chip_gen: v6e
topology: v6e:2x2x1
jax: 0.10.0
libtpu: 0.0.40
codegen_flags: <defaults>
</compile_context>

<pallas_src>
import functools

import numpy as np

import jax
import jax.numpy as jnp
from jax.experimental import pallas as pl
from jax.experimental.pallas import tpu as pltpu


_OUT_BLOCK_BUDGET = 8 * 1024 * 1024      # per-step output block target
_VMEM_FOOTPRINT_CAP = 40 * 1024 * 1024   # keep pipeline buffers v7x-safe (64 MiB VMEM)
_MAX_FLAT_PLANE = 256                    # H*W cap for the flattened whole-plane matmul
_MAX_ROW_MATMUL_W = 256                  # W cap for the dense per-row replication matmul


# ----------------------------------------------------------------------------
# Small helpers
# ----------------------------------------------------------------------------
def _divisors(n):
    small, large = [], []
    d = 1
    while d * d <= n:
        if n % d == 0:
            small.append(d)
            if d * d != n:
                large.append(n // d)
        d += 1
    return small + large[::-1]


def _sublane(dtype):
    # dtype-aware sublane multiple: 8 for f32, 16 for bf16, 32 for int8/fp8.
    return max(8, 32 // jnp.dtype(dtype).itemsize)


def _num_terms(dtype):
    """bf16 terms needed so that their exact sum reproduces this float dtype."""
    if dtype == jnp.bfloat16:
        return 1
    if dtype == jnp.float16:
        return 2
    return 3  # float32: 3 x 8 mantissa bits cover the 24-bit mantissa exactly


def _bf16_terms(x):
    """Split x into bf16 terms whose exact (f32) sum equals x."""
    n = _num_terms(x.dtype)
    if n == 1:
        return [x]
    xf = x.astype(jnp.float32)
    terms = []
    for k in range(n):
        c = xf.astype(jnp.bfloat16)
        terms.append(c)
        if k + 1 < n:
            xf = xf - c.astype(jnp.float32)
    return terms


@functools.lru_cache(maxsize=None)
def _plane_repl_matrix(H, W, s):
    """(H*W, Ho*Wo) 0/1 matrix: out_plane_flat = in_plane_flat @ R."""
    Wo = W * s
    rows = np.arange(H * W)
    cols = np.arange(H * W * s * s)
    h, w = rows // W, rows % W
    ho, wo = cols // Wo, cols % Wo
    r = (h[:, None] == (ho[None, :] // s)) & (w[:, None] == (wo[None, :] // s))
    return jnp.asarray(r, dtype=jnp.bfloat16)


@functools.lru_cache(maxsize=None)
def _row_repl_matrix(W, s):
    """(W, s*Wo) 0/1 matrix for the (P*H, s*Wo) output view.

    Row h of that view holds the s identical, lane-expanded copies of input
    row h concatenated, so R[w, r*Wo + wo] = 1 iff wo // s == w.
    """
    Wo = W * s
    wo = np.arange(s * Wo) % Wo
    r = np.arange(W)[:, None] == (wo[None, :] // s)
    return jnp.asarray(r, dtype=jnp.bfloat16)


def _pick_tiles(M, K, Nout, isz, sub, r_col_bytes, col_split=True):
    """Pick (row tile, column tile) for a (M,K)@(K,Nout) replication matmul.

    Prefers (a) output blocks within the budget and a v7x-safe VMEM footprint,
    (b) >= 2 grid steps, (c) >= 4 and even steps (both v7x TensorCores busy,
    pipelining on), then the largest output block (amortize ~0.35us/step).
    """
    tm_c = [d for d in _divisors(M) if d % sub == 0]
    if M not in tm_c:
        tm_c.append(M)
    if col_split:
        tn_c = [d for d in _divisors(Nout) if d % 128 == 0]
        if Nout not in tn_c:
            tn_c.append(Nout)
    else:
        tn_c = [Nout]
    best = None
    for tm in tm_c:
        for tn in tn_c:
            out_blk = tm * tn * isz
            foot = (3 * tm * K * isz          # input row blocks (up to 3 buffers)
                    + 2 * tn * r_col_bytes    # bf16 replication slab (double-buffered)
                    + 2 * out_blk             # output blocks (double-buffered)
                    + tm * tn * 4)            # in-kernel f32 accumulator / temp
            steps = (M // tm) * (Nout // tn)
            fits = out_blk <= _OUT_BLOCK_BUDGET and foot <= _VMEM_FOOTPRINT_CAP
            key = (fits, steps >= 2, steps >= 4 and steps % 2 == 0,
                   out_blk if fits else -foot)
            if best is None or key > best[0]:
                best = (key, tm, tn, foot)
    return best[1], best[2], best[3]


def _input_spec(shape, index_map, depth):
    """Input BlockSpec with optional deeper buffering (guarded, best-effort)."""
    if depth is not None:
        try:
            return pl.BlockSpec(shape, index_map, pipeline_mode=pl.Buffered(depth))
        except Exception:  # older API without pipeline_mode / Buffered
            pass
    return pl.BlockSpec(shape, index_map)


# ----------------------------------------------------------------------------
# Kernels
# ----------------------------------------------------------------------------
def _repl_matmul_kernel(x_ref, r_ref, o_ref):
    """o = x @ r on the MXU, r is an exact 0/1 bf16 replication matrix.

    x is split into bf16 terms that sum exactly to x, so every output element
    is reproduced bit-exactly while all replication work runs on the MXU
    (no broadcast/reshape relayouts, no XLU/vst pressure).
    """
    acc = None
    for term in _bf16_terms(x_ref[...]):
        part = jnp.dot(term, r_ref[...], preferred_element_type=jnp.float32)
        acc = part if acc is None else acc + part
    o_ref[...] = acc.astype(o_ref.dtype)


def _broadcast_rows_kernel(x_ref, o_ref, *, s):
    """Fallback: VPU broadcast expansion of (TM, W) rows into (TM, s*W*s)."""
    x = x_ref[...]
    tm, w = x.shape
    y = jnp.broadcast_to(x[:, None, :, None], (tm, s, w, s))
    o_ref[...] = y.reshape(tm, s * w * s)


# ----------------------------------------------------------------------------
# Launchers
# ----------------------------------------------------------------------------
def _repl_matmul(x2, repl, n_terms):
    """out (M, Nout) = x2 (M, K) @ repl (K, Nout) via pipelined Pallas matmul."""
    M, K = x2.shape
    assert repl.shape[0] == K
    Nout = repl.shape[1]
    dt = x2.dtype
    isz = jnp.dtype(dt).itemsize
    sub = _sublane(dt)
    TM, TN, foot = _pick_tiles(M, K, Nout, isz, sub, r_col_bytes=K * 2)
    n_i, n_j = M // TM, Nout // TN

    cost = pl.CostEstimate(
        flops=2 * n_terms * M * K * Nout,
        transcendentals=0,
        bytes_accessed=(M * K + M * Nout) * isz + K * Nout * 2,
    )
    params = pltpu.CompilerParams(
        dimension_semantics=("parallel",) * (1 if n_j == 1 else 2),
        # explicit footprint + headroom instead of the old max(32 MiB, 3*(in+out))
        vmem_limit_bytes=max(16 * 1024 * 1024, foot + 4 * 1024 * 1024),
    )
    if n_j == 1:
        grid = (n_i,)
        x_map = lambda i: (i, 0)
        r_map = lambda i: (0, 0)       # replication matrix resident (loaded once)
        o_map = lambda i: (i, 0)
    else:
        # Column-slab axis outermost: the 0/1 replication matrix streams through
        # VMEM exactly once; only the (s^2-times smaller) input rows are re-read.
        grid = (n_j, n_i)
        x_map = lambda j, i: (i, 0)
        r_map = lambda j, i: (0, j)
        o_map = lambda j, i: (i, j)

    def _build(input_depth):
        return pl.pallas_call(
            _repl_matmul_kernel,
            out_shape=jax.ShapeDtypeStruct((M, Nout), dt),
            grid=grid,
            in_specs=[_input_spec((TM, K), x_map, input_depth),
                      pl.BlockSpec((K, TN), r_map)],
            out_specs=pl.BlockSpec((TM, TN), o_map),
            compiler_params=params,
            cost_estimate=cost,
        )

    try:
        # Triple-buffer the small input so read-DMA jitter hides under writeback.
        return _build(3)(x2, repl)
    except Exception:
        # Best-effort: fall back to default double buffering if the deeper
        # pipeline mode is not supported by this JAX/Mosaic version.
        return _build(None)(x2, repl)


def _upsample_broadcast(x, s):
    """Fallback path: per-row VPU broadcast (integer dtypes / very wide planes)."""
    N, C, H, W = x.shape
    M, Nout = N * C * H, s * s * W
    isz = jnp.dtype(x.dtype).itemsize
    sub = _sublane(x.dtype)
    TM, _, foot = _pick_tiles(M, W, Nout, isz, sub, r_col_bytes=0, col_split=False)
    n_i = M // TM

    cost = pl.CostEstimate(flops=0, transcendentals=0,
                           bytes_accessed=(M * W + M * Nout) * isz)
    out = pl.pallas_call(
        functools.partial(_broadcast_rows_kernel, s=s),
        out_shape=jax.ShapeDtypeStruct((M, Nout), x.dtype),
        grid=(n_i,),
        in_specs=[pl.BlockSpec((TM, W), lambda i: (i, 0))],
        out_specs=pl.BlockSpec((TM, Nout), lambda i: (i, 0)),
        compiler_params=pltpu.CompilerParams(
            dimension_semantics=("parallel",),
            vmem_limit_bytes=max(16 * 1024 * 1024, foot + 4 * 1024 * 1024)),
        cost_estimate=cost,
    )(x.reshape(M, W))
    return out.reshape(N, C, H * s, W * s)


def upsample_nearest(x: jax.Array, scale_factor) -> jax.Array:
    """Nearest-neighbor upsample of an NCHW tensor by an integer scale factor.

    Matches torch.nn.functional.interpolate(x, scale_factor, mode='nearest')
    for integer, uniform scale factors: out[i, j] = x[i // s, j // s].
    """
    s = int(scale_factor)
    assert s >= 1 and float(scale_factor) == float(s), "integer scale factors only"
    assert x.ndim == 4, "expected NCHW input"
    if s == 1:
        return x

    N, C, H, W = x.shape
    P, Ho, Wo = N * C, H * s, W * s
    dt = x.dtype
    is_float = jnp.issubdtype(dt, jnp.floating) and jnp.dtype(dt).itemsize <= 4
    n_terms = _num_terms(dt)
    D_in, D_out = H * W, Ho * Wo

    if is_float and D_in <= _MAX_FLAT_PLANE and Wo <= 256:
        # Path A: narrow planes -> flatten whole planes to lane-dense rows and do
        # the full (H*W -> Ho*Wo) replication as one MXU matmul (no reshapes).
        out = _repl_matmul(x.reshape(P, D_in), _plane_repl_matrix(H, W, s), n_terms)
        return out.reshape(N, C, Ho, Wo)

    if is_float and W <= _MAX_ROW_MATMUL_W:
        # Path B: output viewed as (P*H, s*Wo); one per-row MXU matmul against a
        # (W, s*Wo) 0/1 matrix covers both the W-repeat and the H-repeat.
        out = _repl_matmul(x.reshape(P * H, W), _row_repl_matrix(W, s), n_terms)
        return out.reshape(N, C, Ho, Wo)

    # Path C: integer dtypes (no MXU int path on v7x) or very wide planes (a
    # dense replication matmul would be MXU-bound on v5e): VPU broadcast.
    # TODO(synk): block-diagonal (128, 128*s) replication matrix per lane group.
    return _upsample_broadcast(x, s)


class Upsample:
    """JAX/Pallas equivalent of the PyTorch Upsample module (mode='nearest')."""

    def __init__(self, scale_factor, mode="nearest"):
        assert mode == "nearest", "only nearest-neighbor mode is implemented"
        self.scale_factor = int(scale_factor)
        self.mode = mode

    def __call__(self, x):
        return upsample_nearest(x, self.scale_factor)


if __name__ == "__main__":
    key = jax.random.PRNGKey(0)

    def _ref(v, s):
        return jnp.repeat(jnp.repeat(v, s, axis=2), s, axis=3)

    # Primary shape (Path A: flattened whole-plane replication matmul), f32.
    x = jax.random.normal(key, (2, 4, 16, 16), dtype=jnp.float32)
    model = Upsample(scale_factor=2, mode="nearest")
    out = jax.block_until_ready(model(x))
    assert out.shape == (2, 4, 32, 32) and out.dtype == x.dtype
    assert jnp.array_equal(out, _ref(x, 2)), "Path A (f32) mismatch"

    # Path A again in bf16 (single MXU pass, dtype-aware sublane tiling).
    xb16 = x.astype(jnp.bfloat16)
    outb16 = jax.block_until_ready(model(xb16))
    assert outb16.dtype == jnp.bfloat16
    assert jnp.array_equal(outb16, _ref(xb16, 2)), "Path A (bf16) mismatch"

    k1, k2 = jax.random.split(key)

    # Path B: plane too big to flatten, per-row (W, s*Wo) replication matmul.
    xrow = jax.random.normal(k1, (1, 2, 8, 160), dtype=jnp.float32)
    outrow = jax.block_until_ready(upsample_nearest(xrow, 2))
    assert jnp.array_equal(outrow, _ref(xrow, 2)), "Path B mismatch"

    # Path C: very wide plane -> VPU broadcast fallback.
    xwide = jax.random.normal(k2, (1, 2, 8, 384), dtype=jnp.float32)
    outwide = jax.block_until_ready(upsample_nearest(xwide, 2))
    assert jnp.array_equal(outwide, _ref(xwide, 2)), "Path C mismatch"

    print("KERNEL_OK")
</pallas_src>

<mosaic_0001>
module attributes {stable_mosaic.version = 11 : i64} {
  func.func @_repl_matmul_kernel(%arg0: i32, %arg1: i32, %arg2: memref<8x256xf32, #tpu.memory_space<vmem>>, %arg3: memref<256x256xbf16, #tpu.memory_space<vmem>>, %arg4: memref<8x256xf32, #tpu.memory_space<vmem>>) attributes {dimension_semantics = [#tpu.dimension_semantics<parallel>, #tpu.dimension_semantics<parallel>], iteration_bounds = array<i64: 4, 1>, scalar_prefetch = 0 : i64, scratch_operands = 0 : i64, tpu.core_type = #tpu.core_type<tc>, window_params = [{transform_indices = @transform_0, window_bounds = array<i64: 8, 256>}, {transform_indices = @transform_1, window_bounds = array<i64: 256, 256>}, {transform_indices = @transform_2, window_bounds = array<i64: 8, 256>}]} {
    %c0 = arith.constant 0 : index
    %c0_0 = arith.constant 0 : index
    %0 = vector.load %arg2[%c0, %c0_0] : memref<8x256xf32, #tpu.memory_space<vmem>>, vector<8x256xf32>
    %1 = arith.truncf %0 : vector<8x256xf32> to vector<8x256xbf16>
    %2 = arith.extf %1 : vector<8x256xbf16> to vector<8x256xf32>
    %3 = arith.subf %0, %2 : vector<8x256xf32>
    %4 = arith.truncf %3 : vector<8x256xf32> to vector<8x256xbf16>
    %5 = arith.extf %4 : vector<8x256xbf16> to vector<8x256xf32>
    %6 = arith.subf %3, %5 : vector<8x256xf32>
    %7 = arith.truncf %6 : vector<8x256xf32> to vector<8x256xbf16>
    %c0_1 = arith.constant 0 : index
    %c0_2 = arith.constant 0 : index
    %8 = vector.load %arg3[%c0_1, %c0_2] : memref<256x256xbf16, #tpu.memory_space<vmem>>, vector<256x256xbf16>
    %cst = arith.constant dense<0.000000e+00> : vector<8x256xf32>
    %9 = tpu.matmul %1, %8, %cst {dimension_numbers = #tpu.dot_dimension_numbers<[1], [0], [0], [1], [0, 0, 1, 1], [], []>} : vector<8x256xbf16>, vector<256x256xbf16>, vector<8x256xf32> -> vector<8x256xf32>
    %c0_3 = arith.constant 0 : index
    %c0_4 = arith.constant 0 : index
    %10 = vector.load %arg3[%c0_3, %c0_4] : memref<256x256xbf16, #tpu.memory_space<vmem>>, vector<256x256xbf16>
    %cst_5 = arith.constant dense<0.000000e+00> : vector<8x256xf32>
    %11 = tpu.matmul %4, %10, %cst_5 {dimension_numbers = #tpu.dot_dimension_numbers<[1], [0], [0], [1], [0, 0, 1, 1], [], []>} : vector<8x256xbf16>, vector<256x256xbf16>, vector<8x256xf32> -> vector<8x256xf32>
    %12 = arith.addf %9, %11 : vector<8x256xf32>
    %c0_6 = arith.constant 0 : index
    %c0_7 = arith.constant 0 : index
    %13 = vector.load %arg3[%c0_6, %c0_7] : memref<256x256xbf16, #tpu.memory_space<vmem>>, vector<256x256xbf16>
    %cst_8 = arith.constant dense<0.000000e+00> : vector<8x256xf32>
    %14 = tpu.matmul %7, %13, %cst_8 {dimension_numbers = #tpu.dot_dimension_numbers<[1], [0], [0], [1], [0, 0, 1, 1], [], []>} : vector<8x256xbf16>, vector<256x256xbf16>, vector<8x256xf32> -> vector<8x256xf32>
    %15 = arith.addf %12, %14 : vector<8x256xf32>
    %c0_9 = arith.constant 0 : index
    %c0_10 = arith.constant 0 : index
    %16 = vector.load %arg4[%c0_9, %c0_10] : memref<8x256xf32, #tpu.memory_space<vmem>>, vector<8x256xf32>
    tpu.vector_store %arg4[%c0_9, %c0_10], %15 {strides = array<i32>} : memref<8x256xf32, #tpu.memory_space<vmem>>, vector<8x256xf32>,
    return
  }
  func.func @transform_0(%arg0: i32, %arg1: i32) -> (i32, i32) {
    %c0_i32 = arith.constant 0 : i32
    %c0_i32_0 = arith.constant 0 : i32
    return %arg1, %c0_i32 : i32, i32
  }
  func.func @transform_1(%arg0: i32, %arg1: i32) -> (i32, i32) {
    %c0_i32 = arith.constant 0 : i32
    %c0_i32_0 = arith.constant 0 : i32
    return %c0_i32, %arg0 : i32, i32
  }
  func.func @transform_2(%arg0: i32, %arg1: i32) -> (i32, i32) {
    %c0_i32 = arith.constant 0 : i32
    return %arg1, %arg0 : i32, i32
  }
}

</mosaic_0001>

<bundles_post_ra>
// kernel: tpu_custom_call.1
= control target key start
LH: loop header
LB: loop body
LE: loop exit
PB: predicated region body
PF: predicated region fallthrough
CT: control target
= control target key end

     0   :  { %7 = vsyncpa [#allocation3], 0  ;;  %s1305_s0 = inlined_call_operand.hbm [shape: f32[8,256], index: 0, kind: input, shape index: {}]   ;;  %s1306_s1 = inlined_call_operand.hbm [shape: bf16[256,1024], index: 1, kind: input, shape index: {}]   ;;  %s1307_s2 = inlined_call_operand.hbm [shape: f32[8,1024], index: 2, kind: output, shape index: {}]  }
   0x1   :  { %8 = vsyncpa [#allocation6], 0 }
   0x2   :  { %10 = vsyncpa [#allocation6 + $0x1], 0 }
   0x3   :  { %11 = vsyncpa [#allocation4], 0 }
   0x4   :  { %13 = vsyncpa [#allocation4 + $0x1], 0  ;;  %s982_s9 = smov 0   ;;  %s984_s10 = smov 0  }
   0x5   :  { %s986_s11 = smov 0   ;;  %s988_s12 = smov 0  }
   0x6   :  { %s990_s13 = smov 0   ;;  %s992_s14 = smov 0  }
   0x7 LB: > { %s646_s15 = sadd.s32 4294967295, %s959_s14   ;;  %s647_s16 = sadd.s32 4294967294, %s959_s14   ;;  %s959_s14 = sphi %s992_s14, %s19_s14   ;;  %s955_s13 = sphi %s990_s13, %s1325_s13   ;;  %s951_s12 = sphi %s988_s12, %s1324_s12   ;;  %s947_s11 = sphi %s986_s11, %s1323_s11   ;;  %s943_s10 = sphi %s984_s10, %s1322_s10   ;;  %s939_s9 = sphi %s982_s9, %s1321_s9  }
   0x8   : > { %s64_s17 = sadd.s32 1, %s947_s11  ;;  %p71_p0 = scmp.ne.s32.totalorder %s947_s11, %s943_s10 }
   0x9   : > { %p72_p1 = scmp.eq.s32.totalorder %s959_s14, 0  ;;  %p77_p2 = scmp.ne.s32.totalorder %s943_s10, %s939_s9 }
   0xa   : > { %p1020_p3 = scmp.eq.s32.totalorder %s646_s15, 0  ;;  %p103_p4 = scmp.eq.s32.totalorder %s646_s15, 3 }
   0xb   : > { %p1024_p5 = por %p72_p1, %p71_p0  ;;  %p109_p6 = scmp.eq.s32.totalorder %s647_s16, 3 }
   0xc   : > { %p1030_p7 = por %p1020_p3, %p77_p2  ;;  %p1034_p8 = por %p103_p4, %p71_p0 }
   0xd   : > { %p1038_p9 = por %p109_p6, %p77_p2  ;;  %p648_p10 = scmp.ge.s32.totalorder %s959_s14, 1 }
   0xe   : > { %s1312_s20 = scalar_select %p1030_p7, 1, 0 }
   0xf   : > { %s1313_s21 = scalar_select %p1034_p8, 1, 0 }
  0x10   : > { %s1314_s22 = scalar_select %p1038_p9, 1, 0 }
  0x11   : > { %p116_p11 = scmp.lt.s32.totalorder %s959_s14, 5  ;;  %s961_s24 = smov [#allocation2]  }
  0x12   : > { %s132_s25 = sshll.u32 %s961_s24, 4  ;;  %p718_p13 = scmp.lt.s32.totalorder %s959_s14, 4  ;;  %s133_s25 = int_to_ptr.vmem [resolvable:$true] %s132_s25 }
  0x13   : > { %p1044_p12 = pnand %p648_p10, %p116_p11  ;;  %s31_s28 = sadd.s32 1, %s955_s13 }
  0x14   : > { %p1053_p1 = pnand %p718_p13, %p1024_p5  ;;  %p33_p4 = scmp.ge.s32.totalorder %s31_s28, 4 }
  0x15   : > { %p705_p0 = pneg %p1044_p12  ;;  %s143_s29 = sand.u32 1, %s947_s11  }
  0x16   : > { %s832_s30 = scalar_lea.vmem %s133_s25, 256  ;;  %p840_p8 = scmp.lt.s32.totalorder %s133_s25, %s133_s25 }
  0x17   : > { %p1059_p2 = pnand %p705_p0, %p1020_p3  ;;  %p833_p10 = scmp.ne.s32.totalorder %s133_s25, %s832_s30 }
  0x18   : > { %p841_p5 = scmp.lt.s32.totalorder %s832_s30, %s832_s30 }
  0x19   : > { %p823_p6 = pneg %p1059_p2 }
  0x1a   : > { %p842_p13 = por %p841_p5, %p840_p8 }
  0x1b   : > { %p835_p11 = pnand %p833_p10, %p823_p6 }
  0x1d   : > { %p836_p9 = pneg %p835_p11 }
  0x1f   : > { %p843_p7 = pnand %p842_p13, %p836_p9 }
  0x21   : > { %846 = shalt.err (!%p843_p7)
}
  0x22   : > { %708 = dma.hbm_to_vmem [thread:$0]  (!%p1059_p2), %s1305_s0, 256, %s133_s25, [#allocation3]  }
  0x23   : > { %s1327_s28 = smov (%p33_p4, %s31_s28), 0  ;;  %s651_s5 = sshll.u32 %s143_s29, 8 }
  0x24   : > { %s61_s6 = ssub.s32 %s955_s13, %s1327_s28  ;;  %s695_s7 = sshll.u32 %s955_s13, 7 }
  0x25   : > { %p62_p0 = scmp.eq.s32.totalorder %s61_s6, 0  ;;  %s153_s16 = scalar_lea.hbm %s1306_s1, %s695_s7 }
  0x26   : > { %s147_s19 = scalar_lea.vmem [#allocation5], %s651_s5  ;;  %s144_s30 = scalar_lea.sflag [#allocation6], %s143_s29 }
  0x27   : > { %s154_s24 = sshll.u32 %s147_s19, 4  ;;  %p849_p7 = pneg %p1053_p1  ;;  %s155_s24 = int_to_ptr.vmem [resolvable:$true] %s154_s24 }
  0x28   : > { %s1083_s27 = scalar_select %p62_p0, %s947_s11, %s64_s17  }
  0x29   : > { %s860_s25 = scalar_lea.vmem %s155_s24, 4096  ;;  %s962_s3 = smov [#allocation5]  }
  0x2a   : > { %p861_p8 = scmp.ne.s32.totalorder %s155_s24, %s860_s25  ;;  %s865_s4 = sshll.u32 %s962_s3, 4  ;;  %s866_s4 = int_to_ptr.vmem [resolvable:$false] %s865_s4 }
  0x2b   : > { %s867_s6 = scalar_lea.vmem %s866_s4, 8192  ;;  %p868_p4 = scmp.lt.s32.totalorder %s155_s24, %s866_s4 }
  0x2c   : > { %p863_p9 = pnand %p861_p8, %p849_p7  ;;  %p869_p6 = scmp.lt.s32.totalorder %s867_s6, %s860_s25 }
  0x2e   : > { %p864_p2 = pneg %p863_p9  ;;  %p870_p10 = por %p869_p6, %p868_p4 }
  0x30   : > { %p871_p11 = pnand %p870_p10, %p864_p2 }
  0x32   : > { %874 = shalt.err (!%p871_p11)
}
  0x33   : > { %s963_s5 = smov 512   ;;  %s964_s17 = smov 128  }
  0x34   : > { %s965_s7 = smov 8   ;;  %166 = sbr.rel (%p1044_p12) target bundleno = 402 (0x192), region = 28 }
  0x35   : > { %712 = dma.hbm_to_vmem [thread:$0]  (!%p1053_p1), %s153_s16, 4096, %s155_s24, %s144_s30, %s963_s5, %s964_s17, %s965_s7  }
  0x39   : > { %926 = dma.done.wait (%p1020_p3), [#allocation3], 256  }
  0x3a   : > { %928 = vsyncadd (%p1020_p3), [#allocation3], 4294967040  ;;  %s1096_s29 = sand.u32 1, %s943_s10   ;;  %p1318_p1 = scmp.ne.s32.totalorder %s1312_s20, 0 }
  0x3b   : > { %s656_s8 = sshll.u32 %s1096_s29, 8  ;;  %s173_s15 = scalar_lea.sflag [#allocation6], %s1096_s29 }
  0x3c   : > { %s1100_s19 = scalar_lea.vmem [#allocation5], %s656_s8 }
  0x3d   : > { %930 = dma.done.wait (%p1318_p1), %s173_s15, 4096  }
  0x3e   : > { %932 = vsyncadd (%p1318_p1), %s173_s15, 4294963200  ;;  %v1107_v0 = vld [vmem:[%s1100_s19 + $0x74] ss:$8 sps:$4 sm:$0xff]   ;;  %v1110_v1 = vld [vmem:[%s1100_s19 + $0x70] ss:$8 sps:$4 sm:$0xff]   ;;  %s657_s18 = sshll.u32 %s1096_s29, 4 }
  0x3f   : > { %407 = vmatprep.subr.bf16.mxu0 %v1107_v0  ;;  %448 = vmatprep.subr.bf16.mxu1 %v1107_v0  ;;  %v1115_v2 = vld [vmem:[%s1100_s19 + $0x64] ss:$8 sps:$4 sm:$0xff]   ;;  %v1120_v3 = vld [vmem:[%s1100_s19 + $0x60] ss:$8 sps:$4 sm:$0xff]   ;;  %v1125_v4 = vld [vmem:[%s1100_s19 + $0x54] ss:$8 sps:$4 sm:$0xff]  }
  0x40   : > { %408 = vmatpush1.bf16.msra.mxu0 %v1110_v1  ;;  %449 = vmatpush1.bf16.msra.mxu1 %v1110_v1  ;;  %v1130_v5 = vld [vmem:[%s1100_s19 + $0x50] ss:$8 sps:$4 sm:$0xff]   ;;  %v1135_v6 = vld [vmem:[%s1100_s19 + $0x44] ss:$8 sps:$4 sm:$0xff]   ;;  %v1140_v7 = vld [vmem:[%s1100_s19 + $0x40] ss:$8 sps:$4 sm:$0xff]  }
  0x41   : > { %409 = vmatprep.subr.bf16.mxu0 %v1115_v2  ;;  %450 = vmatprep.subr.bf16.mxu1 %v1115_v2  ;;  %v1145_v8 = vld [vmem:[%s1100_s19 + $0x34] ss:$8 sps:$4 sm:$0xff]   ;;  %v1150_v9 = vld [vmem:[%s1100_s19 + $0x30] ss:$8 sps:$4 sm:$0xff]   ;;  %v1155_v10 = vld [vmem:[%s1100_s19 + $0x24] ss:$8 sps:$4 sm:$0xff]  }
  0x42   : > { %v1160_v11 = vld [vmem:[%s1100_s19 + $0x20] ss:$8 sps:$4 sm:$0xff]   ;;  %v1165_v12 = vld [vmem:[%s1100_s19 + $0x14] ss:$8 sps:$4 sm:$0xff]   ;;  %v1170_v15 = vld [vmem:[%s1100_s19 + $0x10] ss:$8 sps:$4 sm:$0xff]  }
  0x43   : > { %v200_v13 = vld [vmem:[#allocation2 + $0x8] sm:$0xff]  ;;  %v1175_v16 = vld [vmem:[%s1100_s19 + $0x4] ss:$8 sps:$4 sm:$0xff]   ;;  %v1180_v19 = vld [vmem:[%s1100_s19] ss:$8 sps:$4 sm:$0xff]   ;;  %s696_s20 = sshll.u32 %s951_s12, 8 }
  0x44   : > { %410 = vmatpush1.bf16.msra.mxu0 %v1120_v3  ;;  %451 = vmatpush1.bf16.msra.mxu1 %v1120_v3  ;;  %v202_v14 = vpack.c.bf16 %v200_v13, %v200_v13  ;;  %v1185_v20 = vld [vmem:[%s1100_s19 + $0xf4] ss:$8 sps:$4 sm:$0xff]   ;;  %v1190_v22 = vld [vmem:[%s1100_s19 + $0xf0] ss:$8 sps:$4 sm:$0xff]   ;;  %v1195_v23 = vld [vmem:[%s1100_s19 + $0xe4] ss:$8 sps:$4 sm:$0xff]   ;;  %s1258_s30 = scalar_lea.hbm %s1307_s2, %s696_s20 }
  0x45   : > { %411 = vmatprep.subr.bf16.mxu0 %v1125_v4  ;;  %452 = vmatprep.subr.bf16.mxu1 %v1125_v4  ;;  %v1200_v24 = vld [vmem:[%s1100_s19 + $0xe0] ss:$8 sps:$4 sm:$0xff]   ;;  %v1205_v25 = vld [vmem:[%s1100_s19 + $0xd4] ss:$8 sps:$4 sm:$0xff]   ;;  %v1210_v26 = vld [vmem:[%s1100_s19 + $0xd0] ss:$8 sps:$4 sm:$0xff]  }
  0x46   : > { %v204_v17 = vunpack.c.l.bf16 %v202_v14  ;;  %480 = vmatprep.mubr.bf16.mxu1 %v202_v14  ;;  %v1215_v27 = vld [vmem:[%s1100_s19 + $0xc4] ss:$8 sps:$4 sm:$0xff]   ;;  %v808_v28 = vld [vmem:[%s1100_s19 + $0xc0] ss:$8 sps:$4 sm:$0xff]   ;;  %v809_v29 = vld [vmem:[%s1100_s19 + $0xb4] ss:$8 sps:$4 sm:$0xff]  }
  0x47   : > { %v811_v30 = vld [vmem:[%s1100_s19 + $0xb0] ss:$8 sps:$4 sm:$0xff]   ;;  %v812_v32 = vld [vmem:[%s1100_s19 + $0xa4] ss:$8 sps:$4 sm:$0xff]   ;;  %v814_v34 = vld [vmem:[%s1100_s19 + $0xa0] ss:$8 sps:$4 sm:$0xff]  }
  0x48   : > { %412 = vmatpush1.bf16.msra.mxu0 %v1130_v5  ;;  %453 = vmatpush1.bf16.msra.mxu1 %v1130_v5  ;;  %v206_v18 = vsub.f32 %v200_v13, %v204_v17  ;;  %v199_v31 = vld [vmem:[#allocation2] sm:$0xff]  ;;  %v818_v39 = vld [vmem:[%s1100_s19 + $0x84] ss:$8 sps:$4 sm:$0xff]   ;;  %v820_v41 = vld [vmem:[%s1100_s19 + $0x80] ss:$8 sps:$4 sm:$0xff]   ;;  %s196_s23 = scalar_lea.vmem [#allocation7], %s657_s18 }
  0x49   : > { %413 = vmatprep.subr.bf16.mxu0 %v1135_v6  ;;  %454 = vmatprep.subr.bf16.mxu1 %v1135_v6  ;;  %v201_v33 = vpack.c.bf16 %v199_v31, %v199_v31  ;;  %v815_v35 = vld [vmem:[%s1100_s19 + $0x94] ss:$8 sps:$4 sm:$0xff]   ;;  %v817_v37 = vld [vmem:[%s1100_s19 + $0x90] ss:$8 sps:$4 sm:$0xff]   ;;  %s551_s26 = sshll.u32 %s196_s23, 4  ;;  %s535_s12 = scalar_lea.sflag [#allocation4], %s1096_s29  ;;  %s1260_s26 = int_to_ptr.vmem [resolvable:$true] %s551_s26 }
  0x4a   : > { %v208_v21 = vpack.c.bf16 %v206_v18, %v206_v18  ;;  %s875_s25 = scalar_lea.vmem %s1260_s26, 256  ;;  %p1319_p12 = scmp.ne.s32.totalorder %s1313_s21, 0 }
  0x4b   : > { %v203_v36 = vunpack.c.l.bf16 %v201_v33  ;;  %p876_p3 = scmp.ne.s32.totalorder %s1260_s26, %s875_s25  ;;  %s966_s3 = smov [#allocation7]  }
  0x4c   : > { %414 = vmatpush1.bf16.msra.mxu0 %v1140_v7  ;;  %455 = vmatpush1.bf16.msra.mxu1 %v1140_v7  ;;  %v210_v38 = vunpack.c.l.bf16 %v208_v21  ;;  %s879_s4 = sshll.u32 %s966_s3, 4  ;;  %s880_s4 = int_to_ptr.vmem [resolvable:$false] %s879_s4 }
  0x4d   : > { %415 = vmatprep.subr.bf16.mxu0 %v1145_v8  ;;  %456 = vmatprep.subr.bf16.mxu1 %v1145_v8  ;;  %v205_v40 = vsub.f32 %v199_v31, %v203_v36  ;;  %p877_p5 = pnand %p876_p3, %p1319_p12  ;;  %s881_s6 = scalar_lea.vmem %s880_s4, 512 }
  0x4e   : > { %439 = vmatprep.mubr.bf16.mxu0 %v208_v21  ;;  %v212_v42 = vsub.f32 %v206_v18, %v210_v38  ;;  %p882_p0 = scmp.lt.s32.totalorder %s1260_s26, %s880_s4  ;;  %p883_p7 = scmp.lt.s32.totalorder %s881_s6, %s875_s25 }
  0x4f   : > { %v207_v43 = vpack.c.bf16 %v205_v40, %v205_v40  ;;  %p878_p13 = pneg %p877_p5 }
  0x50   : > { %416 = vmatpush1.bf16.msra.mxu0 %v1150_v9  ;;  %457 = vmatpush1.bf16.msra.mxu1 %v1150_v9  ;;  %v214_v44 = vpack.c.bf16 %v212_v42, %v212_v42  ;;  %p884_p8 = por %p883_p7, %p882_p0 }
  0x51   : > { %417 = vmatprep.subr.bf16.mxu0 %v1155_v10  ;;  %458 = vmatprep.subr.bf16.mxu1 %v1155_v10  ;;  %v209_v45 = vunpack.c.l.bf16 %v207_v43 }
  0x52   : > { %p885_p9 = pnand %p884_p8, %p878_p13 }
  0x53   : > { %v211_v46 = vsub.f32 %v205_v40, %v209_v45 }
  0x54   : > { %418 = vmatpush1.bf16.msra.mxu0 %v1160_v11  ;;  %459 = vmatpush1.bf16.msra.mxu1 %v1160_v11 }
  0x55   : > { %419 = vmatprep.subr.bf16.mxu0 %v1165_v12  ;;  %460 = vmatprep.subr.bf16.mxu1 %v1165_v12  ;;  %v213_v47 = vpack.c.bf16 %v211_v46, %v211_v46 }
  0x58   : > { %420 = vmatpush1.bf16.msra.mxu0 %v1170_v15  ;;  %461 = vmatpush1.bf16.msra.mxu1 %v1170_v15 }
  0x59   : > { %421 = vmatprep.subr.bf16.mxu0 %v1175_v16  ;;  %462 = vmatprep.subr.bf16.mxu1 %v1175_v16 }
  0x5c   : > { %422 = vmatpush1.bf16.msra.mxu0 %v1180_v19  ;;  %463 = vmatpush1.bf16.msra.mxu1 %v1180_v19 }
  0x5d   : > { %423 = vmatprep.subr.bf16.mxu0 %v1185_v20  ;;  %464 = vmatprep.subr.bf16.mxu1 %v1185_v20 }
  0x60   : > { %424 = vmatpush2.bf16.msra.mxu0 %v1190_v22  ;;  %465 = vmatpush2.bf16.msra.mxu1 %v1190_v22 }
  0x61   : > { %425 = vmatprep.subr.bf16.mxu0 %v1195_v23  ;;  %466 = vmatprep.subr.bf16.mxu1 %v1195_v23 }
  0x64   : > { %426 = vmatpush2.bf16.msra.mxu0 %v1200_v24  ;;  %467 = vmatpush2.bf16.msra.mxu1 %v1200_v24 }
  0x65   : > { %427 = vmatprep.subr.bf16.mxu0 %v1205_v25  ;;  %468 = vmatprep.subr.bf16.mxu1 %v1205_v25 }
  0x68   : > { %428 = vmatpush2.bf16.msra.mxu0 %v1210_v26  ;;  %469 = vmatpush2.bf16.msra.mxu1 %v1210_v26 }
  0x69   : > { %429 = vmatprep.subr.bf16.mxu0 %v1215_v27  ;;  %470 = vmatprep.subr.bf16.mxu1 %v1215_v27 }
  0x6c   : > { %430 = vmatpush2.bf16.msra.mxu0 %v808_v28  ;;  %471 = vmatpush2.bf16.msra.mxu1 %v808_v28 }
  0x6d   : > { %431 = vmatprep.subr.bf16.mxu0 %v809_v29  ;;  %472 = vmatprep.subr.bf16.mxu1 %v809_v29 }
  0x70   : > { %432 = vmatpush2.bf16.msra.mxu0 %v811_v30  ;;  %473 = vmatpush2.bf16.msra.mxu1 %v811_v30 }
  0x71   : > { %433 = vmatprep.subr.bf16.mxu0 %v812_v32  ;;  %474 = vmatprep.subr.bf16.mxu1 %v812_v32 }
  0x74   : > { %434 = vmatpush2.bf16.msra.mxu0 %v814_v34  ;;  %475 = vmatpush2.bf16.msra.mxu1 %v814_v34 }
  0x75   : > { %435 = vmatprep.subr.bf16.mxu0 %v815_v35  ;;  %476 = vmatprep.subr.bf16.mxu1 %v815_v35 }
  0x78   : > { %436 = vmatpush2.bf16.msra.mxu0 %v817_v37  ;;  %477 = vmatpush2.bf16.msra.mxu1 %v817_v37 }
  0x79   : > { %437 = vmatprep.subr.bf16.mxu0 %v818_v39  ;;  %478 = vmatprep.subr.bf16.mxu1 %v818_v39 }
  0x7c   : > { %438 = vmatpush2.bf16.msra.mxu0 %v820_v41  ;;  %479 = vmatpush2.bf16.msra.mxu1 %v820_v41 }
  0x7d   : > { %489 = vmatprep.subr.bf16.mxu0 %v1107_v0 }
  0x7f   : > { %440 = vmatmul.mubr.bf16.vlgmr.msra.gmra.mxu0 %v207_v43  ;;  %481 = vmatmul.mubr.bf16.vlgmr.msra.gmra.mxu1 %v201_v33 }
  0x80   : > { %490 = vmatpush1.bf16.msra.mxu0 %v1110_v1  ;;  %521 = vmatprep.mubr.bf16.mxu0 %v214_v44 }
  0x81   : > { %491 = vmatprep.subr.bf16.mxu0 %v1115_v2 }
  0x84   : > { %492 = vmatpush1.bf16.msra.mxu0 %v1120_v3 }
  0x85   : > { %493 = vmatprep.subr.bf16.mxu0 %v1125_v4 }
  0x88   : > { %494 = vmatpush1.bf16.msra.mxu0 %v1130_v5 }
  0x89   : > { %495 = vmatprep.subr.bf16.mxu0 %v1135_v6 }
  0x8c   : > { %496 = vmatpush1.bf16.msra.mxu0 %v1140_v7 }
  0x8d   : > { %497 = vmatprep.subr.bf16.mxu0 %v1145_v8 }
  0x90   : > { %498 = vmatpush1.bf16.msra.mxu0 %v1150_v9 }
  0x91   : > { %499 = vmatprep.subr.bf16.mxu0 %v1155_v10 }
  0x94   : > { %500 = vmatpush1.bf16.msra.mxu0 %v1160_v11 }
  0x95   : > { %501 = vmatprep.subr.bf16.mxu0 %v1165_v12 }
  0x98   : > { %502 = vmatpush1.bf16.msra.mxu0 %v1170_v15 }
  0x99   : > { %503 = vmatprep.subr.bf16.mxu0 %v1175_v16 }
  0x9c   : > { %504 = vmatpush1.bf16.msra.mxu0 %v1180_v19 }
  0x9d   : > { %505 = vmatprep.subr.bf16.mxu0 %v1185_v20 }
  0xa0   : > { %506 = vmatpush2.bf16.msra.mxu0 %v1190_v22 }
  0xa1   : > { %507 = vmatprep.subr.bf16.mxu0 %v1195_v23 }
  0xa4   : > { %508 = vmatpush2.bf16.msra.mxu0 %v1200_v24 }
  0xa5   : > { %509 = vmatprep.subr.bf16.mxu0 %v1205_v25 }
  0xa8   : > { %510 = vmatpush2.bf16.msra.mxu0 %v1210_v26 }
  0xa9   : > { %511 = vmatprep.subr.bf16.mxu0 %v1215_v27 }
  0xac   : > { %512 = vmatpush2.bf16.msra.mxu0 %v808_v28 }
  0xad   : > { %513 = vmatprep.subr.bf16.mxu0 %v809_v29 }
  0xb0   : > { %514 = vmatpush2.bf16.msra.mxu0 %v811_v30 }
  0xb1   : > { %515 = vmatprep.subr.bf16.mxu0 %v812_v32 }
  0xb4   : > { %516 = vmatpush2.bf16.msra.mxu0 %v814_v34 }
  0xb5   : > { %517 = vmatprep.subr.bf16.mxu0 %v815_v35 }
  0xb8   : > { %518 = vmatpush2.bf16.msra.mxu0 %v817_v37 }
  0xb9   : > { %519 = vmatprep.subr.bf16.mxu0 %v818_v39 }
  0xbc   : > { %520 = vmatpush2.bf16.msra.mxu0 %v820_v41 }
  0xbf   : > { %522 = vmatmul.mubr.bf16.vlgmr.msra.gmra.mxu0 %v213_v47 }
 0x13f   : > { %v441_v48 = vpop.f32.mrf.mxu0  ;;  %v482_v49 = vpop.f32.mrf.mxu1 }
 0x140   : > { %v483_v56 = vadd.f32 %v482_v49, %v441_v48 }
 0x141   : > { %v443_v50 = vpop.f32.mrf.mxu0  ;;  %v484_v51 = vpop.f32.mrf.mxu1 }
 0x142   : > { %v485_v58 = vadd.f32 %v484_v51, %v443_v50 }
 0x143   : > { %v445_v52 = vpop.f32.mrf.mxu0  ;;  %v486_v53 = vpop.f32.mrf.mxu1 }
 0x145   : > { %v446_v54 = vpop.f32.mrf.mxu0  ;;  %v487_v55 = vpop.f32.mrf.mxu1 }
 0x17f   : > { %v523_v57 = vpop.f32.mrf.mxu0 }
 0x180   : > { %v530_v59 = vadd.f32 %v523_v57, %v483_v56 }
 0x181   : > { %v525_v60 = vpop.f32.mrf.mxu0 }
 0x182   : > { %532 = vst [vmem:[%s196_s23] sm:$0xff] %v530_v59  ;;  %v531_v61 = vadd.f32 %v525_v60, %v485_v58 }
 0x183   : > { %v527_v62 = vpop.f32.mrf.mxu0 }
 0x184   : > { %533 = vst [vmem:[%s196_s23 + $0x8] sm:$0xff] %v531_v61 }
 0x185   : > { %v528_v63 = vpop.f32.mrf.mxu0 }
 0x186   : > { %888 = shalt.err (!%p885_p9)
}
 0x187   : > { %s889_s5 = scalar_lea.hbm %s1258_s30, 256  ;;  %s893_s29 = scalar_lea.hbm %s1307_s2, 1024 }
 0x188   : > { %p890_p2 = scmp.ne.s32.totalorder %s1258_s30, %s889_s5  ;;  %p894_p10 = scmp.lt.s32.totalorder %s1258_s30, %s1307_s2 }
 0x189   : > { %p895_p11 = scmp.lt.s32.totalorder %s893_s29, %s889_s5 }
 0x18a   : > { %p891_p4 = pnand %p890_p2, %p1319_p12 }
 0x18b   : > { %p896_p1 = por %p895_p11, %p894_p10 }
 0x18c   : > { %p892_p6 = pneg %p891_p4 }
 0x18e   : > { %p897_p3 = pnand %p896_p1, %p892_p6 }
 0x190   : > { %900 = shalt.err (!%p897_p3)
}
 0x191   : > { %703 = dma.vmem_to_hbm [thread:$0]  (%p1319_p12), %s1260_s26, 256, %s1258_s30, %s535_s12  }
 0x192 PF: > { %p720_p5 = scmp.ge.s32.totalorder %s959_s14, 2  ;;  %s563_s19 = sand.u32 1, %s939_s9  }
 0x193   : > { %p1320_p13 = scmp.ne.s32.totalorder %s1314_s22, 0  ;;  %s564_s18 = scalar_lea.sflag [#allocation4], %s563_s19 }
 0x195   : > { %p714_p0 = pnand %p720_p5, %p1320_p13 }
 0x197   : > { %p715_p7 = pneg %p714_p0 }
 0x199   : > { %934 = dma.done.wait (%p715_p7), %s564_s18, 256  }
 0x19a   : > { %936 = vsyncadd (%p715_p7), %s564_s18, 4294967040  ;;  %s19_s14 = sadd.s32 1, %s959_s14   ;;  %s1321_s9 = smov %s943_s10 }
 0x19b   : > { %p16_p8 = scmp.ge.s32.totalorder %s19_s14, 6   ;;  %s1322_s10 = smov %s947_s11 }
 0x19c   : > { %s1323_s11 = smov %s1083_s27  ;;  %s1324_s12 = smov %s955_s13 }
 0x19d   : > { %s1325_s13 = smov %s1327_s28  ;;  %18 = sbr.rel (!%p16_p8) target bundleno = 7 (0x7), region = 79 }
 0x1a2   :  { %569 = vsyncpa [#allocation3], 1 }
 0x1a3   :  { %571 = vsyncpa [#allocation3 + $0x1], 1 }
 0x1a4   :  { %572 = vsyncpa [#allocation6], 1 }
 0x1a5   :  { %574 = vsyncpa [#allocation6 + $0x1], 1 }
 0x1a6   :  { %575 = vsyncpa [#allocation4], 1 }
 0x1a7   :  { %577 = vsyncpa [#allocation4 + $0x1], 1 }

</bundles_post_ra>
